<compile_context>
chip_gen: v6e
topology: v6e:2x2x1
jax: 0.10.0
libtpu: 0.0.40
codegen_flags: <defaults>
</compile_context>

<pallas_src>
import jax
import jax.numpy as jnp
from jax.experimental import pallas as pl
from jax.experimental.pallas import tpu as pltpu

_TWO_LOG2 = 1.3862943611198906  # 2 * ln(2)


def mod_softplus2_kernel(x_ref, d_ref, o_ref):
    x = x_ref[...]
    d = d_ref[...]
    # Numerically stable softplus: max(x, 0) + log1p(exp(-|x|)).
    sp = jnp.maximum(x, 0.0) + jnp.log1p(jnp.exp(-jnp.abs(x)))
    o_ref[...] = (d * (1.0 + d) * (2.0 * sp - x - _TWO_LOG2)).astype(o_ref.dtype)


def mod_softplus2(x, d, *, max_block_rows=1024):
    """Pallas implementation of mod_softplus2.forward(x, d)."""
    out_shape = jnp.broadcast_shapes(x.shape, d.shape)
    xb = jnp.broadcast_to(x, out_shape).astype(jnp.float32).reshape(-1)
    db = jnp.broadcast_to(d, out_shape).astype(jnp.float32).reshape(-1)

    lane = 128
    n = xb.shape[0]
    rows = pl.cdiv(n, lane)

    # Tile rows: multiple of 8 sublanes; large tiles amortize per-step overhead.
    if rows <= max_block_rows:
        tb = max(8, ((rows + 7) // 8) * 8)
    else:
        tb = max_block_rows
    rows_p = ((rows + tb - 1) // tb) * tb

    pad = rows_p * lane - n
    if pad:
        xb = jnp.pad(xb, (0, pad))
        db = jnp.pad(db, (0, pad))
    x2 = xb.reshape(rows_p, lane)
    d2 = db.reshape(rows_p, lane)

    spec = pl.BlockSpec((tb, lane), lambda i: (i, 0))
    out = pl.pallas_call(
        mod_softplus2_kernel,
        out_shape=jax.ShapeDtypeStruct((rows_p, lane), jnp.float32),
        grid=(rows_p // tb,),
        in_specs=[spec, spec],
        out_specs=spec,
        compiler_params=pltpu.CompilerParams(
            dimension_semantics=("parallel",)),
        cost_estimate=pl.CostEstimate(
            flops=10 * rows_p * lane,
            transcendentals=2 * rows_p * lane,   # exp + log1p per element
            bytes_accessed=3 * rows_p * lane * 4),
    )(x2, d2)

    return out.reshape(-1)[:n].reshape(out_shape)


def mod_softplus2_reference(x, d):
    """Pure-JAX reference matching the PyTorch module."""
    return d * (1 + d) * (2.0 * jax.nn.softplus(x) - x - 2.0 * jnp.log(2.0))


if __name__ == "__main__":
    key = jax.random.PRNGKey(0)
    kx, kd = jax.random.split(key)
    # Small shapes consistent with an elementwise module on a 4-D activation.
    x = jax.random.normal(kx, (2, 4, 16, 16), jnp.float32) * 3.0
    d = jax.random.uniform(kd, (2, 4, 16, 16), jnp.float32)

    y = mod_softplus2(x, d)
    y = jax.block_until_ready(y)

    y_ref = mod_softplus2_reference(x, d)
    assert y.shape == x.shape
    assert jnp.allclose(y, y_ref, atol=1e-5, rtol=1e-5), "mismatch vs reference"

    print("KERNEL_OK")
</pallas_src>

<mosaic_0001>
module attributes {stable_mosaic.version = 11 : i64} {
  func.func @mod_softplus2_kernel(%arg0: i32, %arg1: memref<16x128xf32, #tpu.memory_space<vmem>>, %arg2: memref<16x128xf32, #tpu.memory_space<vmem>>, %arg3: memref<16x128xf32, #tpu.memory_space<vmem>>) attributes {dimension_semantics = [#tpu.dimension_semantics<parallel>], iteration_bounds = array<i64: 1>, scalar_prefetch = 0 : i64, scratch_operands = 0 : i64, tpu.core_type = #tpu.core_type<tc>, window_params = [{transform_indices = @transform_0, window_bounds = array<i64: 16, 128>}, {transform_indices = @transform_1, window_bounds = array<i64: 16, 128>}, {transform_indices = @transform_2, window_bounds = array<i64: 16, 128>}]} {
    %c0 = arith.constant 0 : index
    %c0_0 = arith.constant 0 : index
    %0 = vector.load %arg1[%c0, %c0_0] : memref<16x128xf32, #tpu.memory_space<vmem>>, vector<16x128xf32>
    %c0_1 = arith.constant 0 : index
    %c0_2 = arith.constant 0 : index
    %1 = vector.load %arg2[%c0_1, %c0_2] : memref<16x128xf32, #tpu.memory_space<vmem>>, vector<16x128xf32>
    %cst = arith.constant 0.000000e+00 : f32
    %2 = vector.broadcast %cst : f32 to vector<16x128xf32>
    %3 = arith.maximumf %0, %2 : vector<16x128xf32>
    %4 = math.absf %0 : vector<16x128xf32>
    %cst_3 = arith.constant 0.000000e+00 : f32
    %5 = vector.broadcast %cst_3 : f32 to vector<16x128xf32>
    %6 = arith.subf %5, %4 : vector<16x128xf32>
    %7 = math.exp %6 : vector<16x128xf32>
    %8 = math.log1p %7 : vector<16x128xf32>
    %9 = arith.addf %3, %8 : vector<16x128xf32>
    %cst_4 = arith.constant 1.000000e+00 : f32
    %10 = vector.broadcast %cst_4 : f32 to vector<16x128xf32>
    %11 = arith.addf %10, %1 : vector<16x128xf32>
    %12 = arith.mulf %1, %11 : vector<16x128xf32>
    %cst_5 = arith.constant 2.000000e+00 : f32
    %13 = vector.broadcast %cst_5 : f32 to vector<16x128xf32>
    %14 = arith.mulf %13, %9 : vector<16x128xf32>
    %15 = arith.subf %14, %0 : vector<16x128xf32>
    %cst_6 = arith.constant 1.38629436 : f32
    %16 = vector.broadcast %cst_6 : f32 to vector<16x128xf32>
    %17 = arith.subf %15, %16 : vector<16x128xf32>
    %18 = arith.mulf %12, %17 : vector<16x128xf32>
    %c0_7 = arith.constant 0 : index
    %c0_8 = arith.constant 0 : index
    %19 = vector.load %arg3[%c0_7, %c0_8] : memref<16x128xf32, #tpu.memory_space<vmem>>, vector<16x128xf32>
    tpu.vector_store %arg3[%c0_7, %c0_8], %18 {strides = array<i32>} : memref<16x128xf32, #tpu.memory_space<vmem>>, vector<16x128xf32>,
    return
  }
  func.func @transform_0(%arg0: i32) -> (i32, i32) {
    %c0_i32 = arith.constant 0 : i32
    %c0_i32_0 = arith.constant 0 : i32
    return %arg0, %c0_i32 : i32, i32
  }
  func.func @transform_1(%arg0: i32) -> (i32, i32) {
    %c0_i32 = arith.constant 0 : i32
    %c0_i32_0 = arith.constant 0 : i32
    return %arg0, %c0_i32 : i32, i32
  }
  func.func @transform_2(%arg0: i32) -> (i32, i32) {
    %c0_i32 = arith.constant 0 : i32
    %c0_i32_0 = arith.constant 0 : i32
    return %arg0, %c0_i32 : i32, i32
  }
}

</mosaic_0001>

<bundles_post_ra>
// kernel: tpu_custom_call.1
= control target key start
LH: loop header
LB: loop body
LE: loop exit
PB: predicated region body
PF: predicated region fallthrough
CT: control target
= control target key end

     0   :  { %7 = vsyncpa [#allocation3], 0  ;;  %s225_s0 = inlined_call_operand.hbm [shape: f32[16,128], index: 0, kind: input, shape index: {}]   ;;  %s226_s1 = inlined_call_operand.hbm [shape: f32[16,128], index: 1, kind: input, shape index: {}]   ;;  %s227_s2 = inlined_call_operand.hbm [shape: f32[16,128], index: 2, kind: output, shape index: {}]  }
   0x1   :  { %8 = vsyncpa [#allocation6], 0 }
   0x2   :  { %9 = vsyncpa [#allocation4], 0  ;;  %s187_s9 = smov [#allocation2]  }
   0x3   :  { %s15_s10 = sshll.u32 %s187_s9, 4  ;;  %s16_s10 = int_to_ptr.vmem [resolvable:$true] %s15_s10 }
   0x4   :  { %s129_s11 = scalar_lea.vmem %s16_s10, 256  ;;  %p134_p1 = scmp.lt.s32.totalorder %s16_s10, %s16_s10 }
   0x5   :  { %p130_p0 = scmp.ne.s32.totalorder %s16_s10, %s129_s11  ;;  %p135_p2 = scmp.lt.s32.totalorder %s129_s11, %s129_s11 }
   0x7   :  { %p136_p3 = por %p135_p2, %p134_p1 }
   0x9   :  { %p137_p4 = pnand %p136_p3, %p130_p0 }
   0xb   :  { %140 = shalt.err (!%p137_p4)
}
   0xc   :  { %s188_s12 = smov 128   ;;  %s189_s13 = smov 8  }
   0xd   :  { %21 = dma.hbm_to_vmem [thread:$0]  %s225_s0, 256, %s16_s10, [#allocation3], %s188_s12, %s188_s12, %s189_s13  }
   0xe   :  { %s190_s16 = smov [#allocation5]  }
   0xf   :  { %s27_s17 = sshll.u32 %s190_s16, 4  ;;  %s28_s17 = int_to_ptr.vmem [resolvable:$true] %s27_s17 }
  0x10   :  { %s149_s18 = scalar_lea.vmem %s28_s17, 256  ;;  %p154_p6 = scmp.lt.s32.totalorder %s28_s17, %s28_s17 }
  0x11   :  { %p150_p5 = scmp.ne.s32.totalorder %s28_s17, %s149_s18  ;;  %p155_p7 = scmp.lt.s32.totalorder %s149_s18, %s149_s18 }
  0x13   :  { %p156_p8 = por %p155_p7, %p154_p6 }
  0x15   :  { %p157_p9 = pnand %p156_p8, %p150_p5 }
  0x17   :  { %160 = shalt.err (!%p157_p9)
}
  0x18   :  { %33 = dma.hbm_to_vmem [thread:$0]  %s226_s1, 256, %s28_s17, [#allocation6], %s188_s12, %s188_s12, %s189_s13  }
  0x19   :  { %181 = dma.done.wait [#allocation3], 256  }
  0x1a   :  { %182 = vsyncadd [#allocation3], 4294967040 }
  0x1b   :  { %183 = dma.done.wait [#allocation6], 256  }
  0x1c   :  { %184 = vsyncadd [#allocation6], 4294967040  ;;  %v40_v0 = vld [vmem:[#allocation2] sm:$0xff]  ;;  %v41_v1 = vld [vmem:[#allocation2 + $0x8] sm:$0xff]  ;;  %s191_s0 = smov [#allocation7]  }
  0x1d   :  { %v46_v2 = vand.u32 2147483647, %v40_v0  ;;  %v47_v3 = vand.u32 2147483647, %v41_v1  ;;  %v44_v20 = vmax.f32 %v40_v0, 0.0  ;;  %v42_v23 = vld [vmem:[#allocation5] sm:$0xff] }
  0x1e   :  { %v45_v25 = vmax.f32 %v41_v1, 0.0  ;;  %v43_v26 = vld [vmem:[#allocation5 + $0x8] sm:$0xff]  ;;  %v74_v30 = vadd.f32 1.0, %v42_v23  ;;  %s93_s1 = sshll.u32 %s191_s0, 4  ;;  %s94_s1 = int_to_ptr.vmem [resolvable:$true] %s93_s1 }
  0x1f   :  { %v48_v4 = vsub.f32 0.0, %v46_v2  ;;  %v49_v5 = vsub.f32 0.0, %v47_v3  ;;  %v75_v33 = vadd.f32 1.0, %v43_v26  ;;  %s161_s21 = scalar_lea.vmem %s94_s1, 256  ;;  %p166_p11 = scmp.lt.s32.totalorder %s94_s1, %s94_s1 }
  0x20   :  { %v76_v36 = vmul.f32 %v74_v30, %v42_v23  ;;  %p162_p10 = scmp.ne.s32.totalorder %s94_s1, %s161_s21  ;;  %p167_p12 = scmp.lt.s32.totalorder %s161_s21, %s161_s21 }
  0x21   :  { %v50_v6 = vmul.f32 1.442695, %v48_v4  ;;  %v52_v7 = vmul.f32 1.442695, %v49_v5  ;;  %v77_v38 = vmul.f32 %v75_v33, %v43_v26 }
  0x22   :  { %p168_p13 = por %p167_p12, %p166_p11 }
  0x23   :  { %113 = vpow2.f32 %v50_v6 }
  0x24   :  { %115 = vpow2.f32 %v52_v7  ;;  %p169_p0 = pnand %p168_p13, %p162_p10 }
  0x30   :  { %v114_v8 = vpop.eup %113 }
  0x31   :  { %v116_v9 = vpop.eup %115  ;;  %v54_v10 = vadd.f32 1.0, %v114_v8  ;;  %v57_v12 = vmul.f32 -0.5, %v114_v8  ;;  %v60_v15 = vand.u32 2147483647, %v114_v8 }
  0x32   :  { %v63_v11 = vadd.f32 1.0, %v116_v9  ;;  %v66_v13 = vmul.f32 -0.5, %v116_v9  ;;  %v69_v17 = vand.u32 2147483647, %v116_v9 }
  0x33   :  { %117 = vlog2.f32 %v54_v10  ;;  %v58_v14 = vadd.f32 1.0, %v57_v12  ;;  %vm61_vm0 = vcmp.lt.f32.partialorder %v60_v15, 0.0004427343 }
  0x34   :  { %119 = vlog2.f32 %v63_v11  ;;  %v67_v16 = vadd.f32 1.0, %v66_v13  ;;  %vm70_vm1 = vcmp.lt.f32.partialorder %v69_v17, 0.0004427343 }
  0x35   :  { %v59_v18 = vmul.f32 %v114_v8, %v58_v14 }
  0x36   :  { %v68_v21 = vmul.f32 %v116_v9, %v67_v16 }
  0x40   :  { %v118_v19 = vpop.eup %117 }
  0x41   :  { %v120_v22 = vpop.eup %119  ;;  %v56_v24 = vmul.f32 0.6931472, %v118_v19 }
  0x42   :  { %v65_v27 = vmul.f32 0.6931472, %v120_v22 }
  0x43   :  { %v62_v28 = vsel %vm61_vm0, %v59_v18, %v56_v24 }
  0x44   :  { %v72_v29 = vadd.f32 %v62_v28, %v44_v20  ;;  %v71_v31 = vsel %vm70_vm1, %v68_v21, %v65_v27 }
  0x45   :  { %v73_v32 = vadd.f32 %v71_v31, %v45_v25 }
  0x46   :  { %v78_v34 = vmul.f32 2.0, %v72_v29 }
  0x47   :  { %v79_v35 = vmul.f32 2.0, %v73_v32 }
  0x48   :  { %v80_v37 = vsub.f32 %v78_v34, %v40_v0 }
  0x49   :  { %v81_v39 = vsub.f32 %v79_v35, %v41_v1 }
  0x4a   :  { %v106_v40 = vadd.f32 -1.3862944, %v80_v37 }
  0x4b   :  { %v107_v41 = vadd.f32 -1.3862944, %v81_v39 }
  0x4c   :  { %v84_v42 = vmul.f32 %v106_v40, %v76_v36 }
  0x4d   :  { %v85_v43 = vmul.f32 %v107_v41, %v77_v38 }
  0x4e   :  { %86 = vst [vmem:[#allocation7] sm:$0xff] %v84_v42 }
  0x4f   :  { %87 = vst [vmem:[#allocation7 + $0x8] sm:$0xff] %v85_v43 }
  0x50   :  { %172 = shalt.err (!%p169_p0)
}
  0x51   :  { %99 = dma.vmem_to_hbm [thread:$0]  %s94_s1, 256, %s227_s2, [#allocation4], %s188_s12, %s188_s12, %s189_s13  }
  0x52   :  { %185 = dma.done.wait [#allocation4], 256  }
  0x53   :  { %186 = vsyncadd [#allocation4], 4294967040 }
  0x54   :  { %103 = vsyncpa [#allocation3], 1 }
  0x55   :  { %104 = vsyncpa [#allocation6], 1 }
  0x56   :  { %105 = vsyncpa [#allocation4], 1 }

</bundles_post_ra>
